<compile_context>
chip_gen: v7x
topology: tpu7x:2x2x1
jax: 0.10.0
libtpu: 0.0.40
codegen_flags: <defaults>
</compile_context>

<pallas_src>
import functools

import jax
import jax.numpy as jnp
import numpy as np
from jax.experimental import pallas as pl
from jax.experimental.pallas import tpu as pltpu


def _nms_mask_kernel(rel_ref, rep_ref, out_ref, *, rel_thr, rep_thr, hp):
    """int8 maxima mask for a (rows, W) block; channels stacked along rows."""
    rows, wp = rep_ref.shape
    rep = rep_ref[...]                        # native dtype, no upcast
    rel = rel_ref[...]
    neg = jnp.asarray(-jnp.inf, rep.dtype)
    rep_t = jnp.asarray(rep_thr, rep.dtype)   # torch promotes the python-float
    rel_t = jnp.asarray(rel_thr, rel.dtype)   # scalar to the tensor dtype

    # Boundary masks, hoisted once per block and shared by every channel.
    row = jax.lax.broadcasted_iota(jnp.int32, (rows, wp), 0)
    col = jax.lax.broadcasted_iota(jnp.int32, (rows, wp), 1)
    r_in_ch = row % hp                        # channel-local row index
    top, bot = r_in_ch == 0, r_in_ch == hp - 1
    lft, rgt = col == 0, col == wp - 1

    # Separable 3x3 max: vertical 3-tap via sublane rolls (channel-boundary
    # rows masked to -inf so rolls never leak across feature maps) ...
    up = jnp.where(top, neg, pltpu.roll(rep, 1, axis=0))            # rep[r-1]
    dn = jnp.where(bot, neg, pltpu.roll(rep, rows - 1, axis=0))     # rep[r+1]
    vmax = jnp.maximum(rep, jnp.maximum(up, dn))
    # ... then horizontal 3-tap via lane rolls on the vertical maxima.
    lf = jnp.where(lft, neg, pltpu.roll(vmax, 1, axis=1))           # [:, c-1]
    rt = jnp.where(rgt, neg, pltpu.roll(vmax, wp - 1, axis=1))      # [:, c+1]
    m = jnp.maximum(vmax, jnp.maximum(lf, rt))

    maxima = (rep == m) & (rep >= rep_t) & (rel >= rel_t)
    out_ref[...] = maxima.astype(jnp.int8)                          # one store


def _round_up(x, mult):
    return -(-x // mult) * mult


def _padded_dim(x, mult, max_overhead=0.25):
    """Pad x up to a multiple of `mult` only if the overhead is modest."""
    xp = _round_up(x, mult)
    return xp if xp - x <= max(1, int(x * max_overhead)) else x


def _vmem_budget():
    """(vmem_limit_bytes, per-input target block bytes), generation-aware."""
    try:
        phys = int(pltpu.get_tpu_info().vmem_capacity_bytes)
    except Exception:  # interpret mode / older jax fallback
        phys = 128 * 1024 * 1024
    # 96 MiB scoped limit on 128-MiB chips (v5e/v6e), 48 MiB on v7x (64 MiB).
    limit = min(96 * 1024 * 1024, (phys * 3) // 4)
    # 2 inputs x 2 pipeline buffers = half the limit; rest for out + temps.
    return limit, limit // 8


def _channels_per_block(n, hp, wp, itemsize, target_bytes):
    """Largest divisor d of n whose (d*hp, wp) input block fits target_bytes,
    keeps 32-sublane-aligned row tiles (valid for f32/bf16 in, int8 out), and
    preferably yields an even number (>=2) of grid steps (DMA overlap + v7x
    two-TensorCore balance)."""
    ch_bytes = max(1, hp * wp * itemsize)
    cap = max(1, target_bytes // ch_bytes)
    legal = [d for d in range(1, n + 1)
             if n % d == 0 and (d == n or (d * hp) % 32 == 0)]
    within = [d for d in legal if d <= cap]
    if not within:
        # Single channel bigger than the budget: smallest legal block.
        # TODO(synk): H-tile with a 1-row halo for the B*C==1 huge-map case.
        return min(legal)
    even = [d for d in within if (n // d) % 2 == 0]
    if even:
        return max(even)
    multi = [d for d in within if n // d >= 2]
    return max(multi) if multi else max(within)


def nms_mask(reliability, repeatability, rel_thr=0.7, rep_thr=0.7):
    """Pallas-computed maxima mask, shape (B, C, H, W), dtype int8 (0/1)."""
    assert reliability.shape == repeatability.shape
    b, c, h, w = repeatability.shape
    n = b * c

    # Lane/sublane-dense padding when cheap; -inf pad keeps the 3x3 max at the
    # true boundary unchanged and forces the halo mask to 0.
    hp = _padded_dim(h, 8)
    wp = _padded_dim(w, 128)

    rep = repeatability.reshape(n, h, w)     # native dtype, no wrapper cast
    rel = reliability.reshape(n, h, w)
    if (hp, wp) != (h, w):
        cfg = ((0, 0), (0, hp - h), (0, wp - w))
        rep = jnp.pad(rep, cfg, constant_values=-jnp.inf)
        rel = jnp.pad(rel, cfg, constant_values=0.0)

    # Fold channels into the row (sublane) axis: free row-major reshape giving
    # one lane-dense 2-D slab and a single fused compute chain per grid step.
    rep2 = rep.reshape(n * hp, wp)
    rel2 = rel.reshape(n * hp, wp)

    itemsize = jnp.dtype(rep2.dtype).itemsize
    vmem_limit, target_bytes = _vmem_budget()
    nb = _channels_per_block(n, hp, wp, itemsize, target_bytes)
    rows = nb * hp

    kernel = functools.partial(_nms_mask_kernel, rel_thr=rel_thr,
                               rep_thr=rep_thr, hp=hp)
    cost = pl.CostEstimate(
        flops=16 * n * hp * wp,
        transcendentals=0,
        bytes_accessed=n * hp * wp * (2 * itemsize + 1),
    )

    mask = pl.pallas_call(
        kernel,
        out_shape=jax.ShapeDtypeStruct((n * hp, wp), jnp.int8),
        grid_spec=pltpu.PrefetchScalarGridSpec(
            num_scalar_prefetch=0,
            grid=(n // nb,),
            in_specs=[
                pl.BlockSpec((rows, wp), lambda i: (i, 0)),
                pl.BlockSpec((rows, wp), lambda i: (i, 0)),
            ],
            out_specs=pl.BlockSpec((rows, wp), lambda i: (i, 0)),
        ),
        compiler_params=pltpu.CompilerParams(
            dimension_semantics=("parallel",),   # no reduction axis
            vmem_limit_bytes=int(vmem_limit),
        ),
        cost_estimate=cost,
    )(rel2, rep2)

    mask = mask.reshape(n, hp, wp)[:, :h, :w]
    return mask.reshape(b, c, h, w)


def non_max_suppression(reliability_list, repeatability_list,
                        rel_thr=0.7, rep_thr=0.7):
    """Full forward: rows [1:3] of nonzero(maxima).T, exactly like the spec."""
    assert len(reliability_list) == len(repeatability_list) == 1
    reliability, repeatability = reliability_list[0], repeatability_list[0]

    mask = nms_mask(reliability, repeatability, rel_thr, rep_thr) != 0

    # nonzero() has a data-dependent shape -> eager, matching torch exactly.
    # (A fully-jitted pipeline could use jnp.nonzero(mask, size=K) instead.)
    idx = jnp.stack(jnp.nonzero(mask))   # (4, K), rows = (b, c, h, w)
    return idx[1:3]                      # spec slices [1:3] -> (c, h)


if __name__ == "__main__":
    key = jax.random.PRNGKey(0)
    k_rel, k_rep = jax.random.split(key)

    B, C, H, W = 2, 4, 16, 16
    reliability = jax.random.uniform(k_rel, (B, C, H, W), dtype=jnp.float32)
    repeatability = jax.random.uniform(k_rep, (B, C, H, W), dtype=jnp.float32)

    out = non_max_suppression([reliability], [repeatability],
                              rel_thr=0.7, rep_thr=0.7)
    out = jax.block_until_ready(out)
    assert out.ndim == 2 and out.shape[0] == 2

    # Correctness check of the Pallas mask against a pure-JAX reference of the
    # torch module (MaxPool2d(3,1,1) == -inf-padded 3x3 window max).
    mask_kernel = np.asarray(nms_mask(reliability, repeatability, 0.7, 0.7) != 0)
    mp = jax.lax.reduce_window(repeatability, -jnp.inf, jax.lax.max,
                               (1, 1, 3, 3), (1, 1, 1, 1), "SAME")
    mask_ref = np.asarray((repeatability == mp)
                          & (repeatability >= 0.7) & (reliability >= 0.7))
    assert np.array_equal(mask_kernel, mask_ref), "Pallas mask != reference"

    print("KERNEL_OK")
</pallas_src>

<mosaic_0001>
module attributes {stable_mosaic.version = 11 : i64} {
  func.func @_nms_mask_kernel(%arg0: i32, %arg1: memref<64x16xf32, #tpu.memory_space<vmem>>, %arg2: memref<64x16xf32, #tpu.memory_space<vmem>>, %arg3: memref<64x16xi8, #tpu.memory_space<vmem>>) attributes {dimension_semantics = [#tpu.dimension_semantics<parallel>], iteration_bounds = array<i64: 2>, scalar_prefetch = 0 : i64, scratch_operands = 0 : i64, tpu.core_type = #tpu.core_type<tc>, window_params = [{transform_indices = @transform_0, window_bounds = array<i64: 64, 16>}, {transform_indices = @transform_1, window_bounds = array<i64: 64, 16>}, {transform_indices = @transform_2, window_bounds = array<i64: 64, 16>}]} {
    %c0 = arith.constant 0 : index
    %c0_0 = arith.constant 0 : index
    %0 = vector.load %arg2[%c0, %c0_0] : memref<64x16xf32, #tpu.memory_space<vmem>>, vector<64x16xf32>
    %c0_1 = arith.constant 0 : index
    %c0_2 = arith.constant 0 : index
    %1 = vector.load %arg1[%c0_1, %c0_2] : memref<64x16xf32, #tpu.memory_space<vmem>>, vector<64x16xf32>
    %2 = tpu.iota {dimensions = array<i32: 0>} : vector<64x16xi32>
    %3 = tpu.iota {dimensions = array<i32: 1>} : vector<64x16xi32>
    %c16_i32 = arith.constant 16 : i32
    %c0_i32 = arith.constant 0 : i32
    %4 = arith.cmpi eq, %c16_i32, %c0_i32 : i32
    %c1_i32 = arith.constant 1 : i32
    %5 = arith.select %4, %c1_i32, %c16_i32 : i32
    %6 = vector.broadcast %5 : i32 to vector<64x16xi32>
    %7 = arith.remsi %2, %6 : vector<64x16xi32>
    %c0_i32_3 = arith.constant 0 : i32
    %8 = vector.broadcast %c0_i32_3 : i32 to vector<64x16xi32>
    %9 = arith.cmpi ne, %7, %8 : vector<64x16xi32>
    %c0_i32_4 = arith.constant 0 : i32
    %10 = vector.broadcast %c0_i32_4 : i32 to vector<64x16xi32>
    %11 = arith.cmpi slt, %7, %10 : vector<64x16xi32>
    %c0_i32_5 = arith.constant 0 : i32
    %12 = arith.cmpi slt, %5, %c0_i32_5 : i32
    %13 = vector.broadcast %12 : i1 to vector<64x16xi1>
    %14 = vector.broadcast %13 : vector<64x16xi1> to vector<64x16xi1>
    %15 = arith.xori %11, %14 : vector<64x16xi1>
    %16 = arith.andi %15, %9 : vector<64x16xi1>
    %17 = vector.broadcast %5 : i32 to vector<64x16xi32>
    %18 = arith.addi %7, %17 : vector<64x16xi32>
    %19 = arith.select %16, %18, %7 : vector<64x16xi1>, vector<64x16xi32>
    %c0_i32_6 = arith.constant 0 : i32
    %20 = vector.broadcast %c0_i32_6 : i32 to vector<64x16xi32>
    %21 = arith.cmpi eq, %19, %20 : vector<64x16xi32>
    %c15_i32 = arith.constant 15 : i32
    %22 = vector.broadcast %c15_i32 : i32 to vector<64x16xi32>
    %23 = arith.cmpi eq, %19, %22 : vector<64x16xi32>
    %c0_i32_7 = arith.constant 0 : i32
    %24 = vector.broadcast %c0_i32_7 : i32 to vector<64x16xi32>
    %25 = arith.cmpi eq, %3, %24 : vector<64x16xi32>
    %c15_i32_8 = arith.constant 15 : i32
    %26 = vector.broadcast %c15_i32_8 : i32 to vector<64x16xi32>
    %27 = arith.cmpi eq, %3, %26 : vector<64x16xi32>
    %c1_i32_9 = arith.constant 1 : i32
    %28 = tpu.dynamic_rotate %0 by %c1_i32_9 dim 0 : vector<64x16xf32>, i32 -> vector<64x16xf32>
    %cst = arith.constant 0xFF800000 : f32
    %29 = vector.broadcast %cst : f32 to vector<64x16xf32>
    %30 = arith.select %21, %29, %28 : vector<64x16xi1>, vector<64x16xf32>
    %c63_i32 = arith.constant 63 : i32
    %31 = tpu.dynamic_rotate %0 by %c63_i32 dim 0 : vector<64x16xf32>, i32 -> vector<64x16xf32>
    %cst_10 = arith.constant 0xFF800000 : f32
    %32 = vector.broadcast %cst_10 : f32 to vector<64x16xf32>
    %33 = arith.select %23, %32, %31 : vector<64x16xi1>, vector<64x16xf32>
    %34 = arith.maximumf %30, %33 : vector<64x16xf32>
    %35 = arith.maximumf %0, %34 : vector<64x16xf32>
    %c1_i32_11 = arith.constant 1 : i32
    %36 = tpu.dynamic_rotate %35 by %c1_i32_11 dim 1 : vector<64x16xf32>, i32 -> vector<64x16xf32>
    %cst_12 = arith.constant 0xFF800000 : f32
    %37 = vector.broadcast %cst_12 : f32 to vector<64x16xf32>
    %38 = arith.select %25, %37, %36 : vector<64x16xi1>, vector<64x16xf32>
    %c15_i32_13 = arith.constant 15 : i32
    %39 = tpu.dynamic_rotate %35 by %c15_i32_13 dim 1 : vector<64x16xf32>, i32 -> vector<64x16xf32>
    %cst_14 = arith.constant 0xFF800000 : f32
    %40 = vector.broadcast %cst_14 : f32 to vector<64x16xf32>
    %41 = arith.select %27, %40, %39 : vector<64x16xi1>, vector<64x16xf32>
    %42 = arith.maximumf %38, %41 : vector<64x16xf32>
    %43 = arith.maximumf %35, %42 : vector<64x16xf32>
    %44 = arith.cmpf oeq, %0, %43 : vector<64x16xf32>
    %cst_15 = arith.constant 0.699999988 : f32
    %45 = vector.broadcast %cst_15 : f32 to vector<64x16xf32>
    %46 = arith.cmpf oge, %0, %45 : vector<64x16xf32>
    %47 = arith.andi %44, %46 : vector<64x16xi1>
    %cst_16 = arith.constant 0.699999988 : f32
    %48 = vector.broadcast %cst_16 : f32 to vector<64x16xf32>
    %49 = arith.cmpf oge, %1, %48 : vector<64x16xf32>
    %50 = arith.andi %47, %49 : vector<64x16xi1>
    %51 = arith.extui %50 : vector<64x16xi1> to vector<64x16xi8>
    %c0_17 = arith.constant 0 : index
    %c0_18 = arith.constant 0 : index
    %52 = vector.load %arg3[%c0_17, %c0_18] : memref<64x16xi8, #tpu.memory_space<vmem>>, vector<64x16xi8>
    tpu.vector_store %arg3[%c0_17, %c0_18], %51 {strides = array<i32>} : memref<64x16xi8, #tpu.memory_space<vmem>>, vector<64x16xi8>,
    return
  }
  func.func @transform_0(%arg0: i32) -> (i32, i32) {
    %c0_i32 = arith.constant 0 : i32
    %c0_i32_0 = arith.constant 0 : i32
    return %arg0, %c0_i32 : i32, i32
  }
  func.func @transform_1(%arg0: i32) -> (i32, i32) {
    %c0_i32 = arith.constant 0 : i32
    %c0_i32_0 = arith.constant 0 : i32
    return %arg0, %c0_i32 : i32, i32
  }
  func.func @transform_2(%arg0: i32) -> (i32, i32) {
    %c0_i32 = arith.constant 0 : i32
    %c0_i32_0 = arith.constant 0 : i32
    return %arg0, %c0_i32 : i32, i32
  }
}

</mosaic_0001>

<bundles_post_ra>
// kernel: tpu_custom_call.1
= control target key start
LH: loop header
LB: loop body
LE: loop exit
PB: predicated region body
PF: predicated region fallthrough
CT: control target
= control target key end

     0   :  { %7 = vsyncpa [#allocation3], 0  ;;  %s1545_s0 = inlined_call_operand.hbm [shape: f32[128,16], index: 0, kind: input, shape index: {}]   ;;  %s1546_s1 = inlined_call_operand.hbm [shape: f32[128,16], index: 1, kind: input, shape index: {}]   ;;  %s1547_s2 = inlined_call_operand.hbm [shape: s8[128,16], index: 2, kind: output, shape index: {}]  }
   0x1   :  { %9 = vsyncpa [#allocation3 + $0x1], 0 }
   0x2   :  { %10 = vsyncpa [#allocation6], 0 }
   0x3   :  { %12 = vsyncpa [#allocation6 + $0x1], 0 }
   0x4   :  { %13 = vsyncpa [#allocation4], 0 }
   0x5   :  { %15 = vsyncpa [#allocation4 + $0x1], 0  ;;  %s980_s9 = smov 0   ;;  %s982_s10 = smov 0  }
   0x6   :  { %s984_s11 = smov 0   ;;  %s986_s12 = smov 0  }
   0x7 LB: > { %s1001_s13 = sadd.s32 4294967295, %s952_s12   ;;  %s742_s14 = sadd.s32 4294967294, %s952_s12   ;;  %s952_s12 = sphi %s986_s12, %s1581_s12   ;;  %s948_s11 = sphi %s984_s11, %s1580_s11   ;;  %s944_s10 = sphi %s982_s10, %s1579_s10   ;;  %s940_s9 = sphi %s980_s9, %s1578_s9  }
   0x8   : > { %s1005_s15 = sadd.s32 1, %s952_s12   ;;  %s28_s16 = sadd.s32 1, %s948_s11 }
   0x9   : > { %s25_s17 = ssub.s32 %s952_s12, %s1005_s15  ;;  %p35_p0 = scmp.ne.s32.totalorder %s948_s11, %s944_s10 }
   0xa   : > { %p26_p1 = scmp.eq.s32.totalorder %s25_s17, 0  ;;  %p36_p2 = scmp.eq.s32.totalorder %s952_s12, 0 }
   0xb   : > { %p41_p3 = scmp.ne.s32.totalorder %s944_s10, %s940_s9  ;;  %p42_p4 = scmp.eq.s32.totalorder %s1001_s13, 0 }
   0xc   : > { %s1017_s18 = scalar_select %p26_p1, %s948_s11, %s28_s16  }
   0xd   : > { %p1019_p5 = por %p36_p2, %p35_p0  ;;  %p1023_p6 = por %p42_p4, %p41_p3 }
   0xe   : > { %p91_p7 = scmp.eq.s32.totalorder %s1001_s13, 1  ;;  %p97_p8 = scmp.eq.s32.totalorder %s742_s14, 1 }
   0xf   : > { %s1551_s20 = scalar_select %p1023_p6, 1, 0 }
  0x10   : > { %p780_p10 = scmp.lt.s32.totalorder %s952_s12, 2  ;;  %p1030_p11 = por %p91_p7, %p35_p0 }
  0x11   : > { %p1034_p12 = por %p97_p8, %p41_p3  ;;  %s1039_s23 = sand.u32 1, %s948_s11  }
  0x12   : > { %s1552_s21 = scalar_select %p1030_p11, 1, 0 }
  0x13   : > { %s1553_s22 = scalar_select %p1034_p12, 1, 0 }
  0x14   : > { %s760_s24 = sshll.u32 %s952_s12, 10  ;;  %s745_s25 = sshll.u32 %s1039_s23, 6 }
  0x15   : > { %s1048_s28 = scalar_lea.hbm %s1545_s0, %s760_s24  ;;  %s121_s29 = scalar_lea.vmem [#allocation2], %s745_s25 }
  0x16   : > { %s128_s30 = sshll.u32 %s121_s29, 4  ;;  %p1054_p13 = pnand %p780_p10, %p1019_p5  ;;  %s1058_s30 = int_to_ptr.vmem [resolvable:$true] %s128_s30 }
  0x17   : > { %s118_s4 = scalar_lea.sflag [#allocation3], %s1039_s23  ;;  %s822_s5 = scalar_lea.hbm %s1048_s28, 1024 }
  0x18   : > { %p823_p0 = scmp.ne.s32.totalorder %s1048_s28, %s822_s5  ;;  %p824_p1 = pneg %p1054_p13 }
  0x19   : > { %s827_s8 = scalar_lea.hbm %s1545_s0, 2048  ;;  %p828_p4 = scmp.lt.u32.totalorder %s1048_s28, %s1545_s0 }
  0x1a   : > { %p825_p2 = pnand %p824_p1, %p823_p0  ;;  %p829_p5 = scmp.lt.u32.totalorder %s827_s8, %s822_s5 }
  0x1b   : > { %p831_p8 = scmp.lt.u32.totalorder %s822_s5, %s1048_s28 }
  0x1c   : > { %p826_p3 = pneg %p825_p2  ;;  %p830_p7 = por %p829_p5, %p828_p4 }
  0x1e   : > { %p832_p10 = por %p831_p8, %p830_p7 }
  0x20   : > { %p833_p9 = pnand %p832_p10, %p826_p3 }
  0x22   : > { %836 = shalt.err (!%p833_p9)
}
  0x23   : > { %s837_s17 = scalar_lea.vmem %s1058_s30, 1024  ;;  %s954_s19 = smov [#allocation2]  }
  0x24   : > { %p838_p0 = scmp.ne.s32.totalorder %s1058_s30, %s837_s17  ;;  %s842_s26 = sshll.u32 %s954_s19, 4  ;;  %s843_s26 = int_to_ptr.vmem [resolvable:$false] %s842_s26 }
  0x25   : > { %s844_s27 = scalar_lea.vmem %s843_s26, 2048  ;;  %p845_p11 = scmp.lt.s32.totalorder %s1058_s30, %s843_s26 }
  0x26   : > { %p840_p2 = pnand %p838_p0, %p824_p1  ;;  %p846_p4 = scmp.lt.s32.totalorder %s844_s27, %s837_s17 }
  0x28   : > { %p841_p12 = pneg %p840_p2  ;;  %p847_p5 = por %p846_p4, %p845_p11 }
  0x2a   : > { %p848_p7 = pnand %p847_p5, %p841_p12 }
  0x2c   : > { %851 = shalt.err (!%p848_p7)
}
  0x2d   : > { %s955_s29 = smov 128   ;;  %s956_s5 = smov 8  }
  0x2e   : > { %772 = dma.hbm_to_vmem [thread:$0]  (!%p1054_p13), %s1048_s28, 1024, %s1058_s30, %s118_s4, %s955_s29, %s955_s29, %s956_s5  }
  0x2f   : > { %p751_p9 = scmp.ge.s32.totalorder %s952_s12, 1  ;;  %p157_p11 = scmp.lt.s32.totalorder %s952_s12, 3 }
  0x30   : > { %s1102_s14 = scalar_lea.hbm %s1546_s1, %s760_s24  ;;  %s142_s16 = scalar_lea.vmem [#allocation5], %s745_s25 }
  0x31   : > { %p1093_p12 = pnand %p751_p9, %p157_p11  ;;  %s149_s17 = sshll.u32 %s142_s16, 4  ;;  %s1106_s17 = int_to_ptr.vmem [resolvable:$true] %s149_s17 }
  0x32   : > { %s139_s28 = scalar_lea.sflag [#allocation6], %s1039_s23  ;;  %s852_s30 = scalar_lea.hbm %s1102_s14, 1024 }
  0x33   : > { %p853_p3 = scmp.ne.s32.totalorder %s1102_s14, %s852_s30  ;;  %s857_s24 = scalar_lea.hbm %s1546_s1, 2048 }
  0x34   : > { %p858_p0 = scmp.lt.u32.totalorder %s1102_s14, %s1546_s1  ;;  %p859_p2 = scmp.lt.u32.totalorder %s857_s24, %s852_s30 }
  0x35   : > { %p855_p8 = pnand %p853_p3, %p824_p1  ;;  %p861_p5 = scmp.lt.u32.totalorder %s852_s30, %s1102_s14 }
  0x36   : > { %p860_p4 = por %p859_p2, %p858_p0 }
  0x37   : > { %p856_p10 = pneg %p855_p8 }
  0x38   : > { %p862_p7 = por %p861_p5, %p860_p4 }
  0x3a   : > { %p863_p9 = pnand %p862_p7, %p856_p10 }
  0x3c   : > { %866 = shalt.err (!%p863_p9)
}
  0x3d   : > { %s867_s25 = scalar_lea.vmem %s1106_s17, 1024  ;;  %s957_s7 = smov [#allocation5]  }
  0x3e   : > { %p868_p11 = scmp.ne.s32.totalorder %s1106_s17, %s867_s25  ;;  %s872_s8 = sshll.u32 %s957_s7, 4  ;;  %s873_s8 = int_to_ptr.vmem [resolvable:$false] %s872_s8 }
  0x3f   : > { %s874_s16 = scalar_lea.vmem %s873_s8, 2048  ;;  %p875_p6 = scmp.lt.s32.totalorder %s1106_s17, %s873_s8 }
  0x40   : > { %p870_p3 = pnand %p868_p11, %p824_p1  ;;  %p876_p0 = scmp.lt.s32.totalorder %s874_s16, %s867_s25 }
  0x42   : > { %p871_p8 = pneg %p870_p3  ;;  %p877_p2 = por %p876_p0, %p875_p6 }
  0x44   : > { %p878_p4 = pnand %p877_p2, %p871_p8 }
  0x46   : > { %881 = shalt.err (!%p878_p4)
}
  0x47   : > { %775 = dma.hbm_to_vmem [thread:$0]  (!%p1054_p13), %s1102_s14, 1024, %s1106_s17, %s139_s28, %s955_s29, %s955_s29, %s956_s5  }
  0x48   : > { %161 = sbr.rel (%p1093_p12) target bundleno = 513 (0x201), region = 28  ;;  %s1140_s30 = sand.u32 (!%p1093_p12), 1, %s944_s10  }
  0x49   : > { %s752_s4 = sshll.u32 (!%p1093_p12), %s1140_s30, 6  ;;  %s164_s19 = scalar_lea.sflag (!%p1093_p12), [#allocation3], %s1140_s30 }
  0x4a   : > { %s1144_s3 = scalar_lea.vmem (!%p1093_p12), [#allocation2], %s752_s4  ;;  %p1556_p6 = scmp.ne.s32.totalorder (!%p1093_p12), %s1551_s20, 0 }
  0x4f   : > { %927 = dma.done.wait (%p1556_p6), %s164_s19, 1024  }
  0x50   : > { %929 = vsyncadd (%p1556_p6), %s164_s19, 4294966272  ;;  %s173_s23 = scalar_lea.sflag [#allocation6], %s1140_s30  ;;  %s1151_s29 = scalar_lea.vmem [#allocation5], %s752_s4 }
  0x51   : > { %931 = dma.done.wait (%p1556_p6), %s173_s23, 1024  }
  0x52   : > { %933 = vsyncadd (%p1556_p6), %s173_s23, 4294966272  ;;  %v223_v0 = vlaneseq  ;;  %v1179_v12 = vld [vmem:[%s1151_s29] sm:$0xff]  ;;  %v1182_v13 = vld [vmem:[%s1151_s29 + $0x8] sm:$0xff]  ;;  %s958_s20 = smov 16   ;;  %vm414_vm10 = vcmask 1047680   ;;  %s959_s5 = smov 113  }
  0x53   : > { %v1185_v14 = vld [vmem:[%s1151_s29 + $0x38] sm:$0xff]  ;;  %v348_v18 = vrot.slane %v1179_v12, 7  ;;  %v373_v20 = vrot.slane %v1179_v12, 1  ;;  %v374_v21 = vrot.slane %v1182_v13, 1  ;;  %v1192_v22 = vld [vmem:[%s1151_s29 + $0x10] sm:$0xff]  ;;  %v349_v25 = vrot.slane %v1182_v13, 7 }
  0x54   : > { %v1158_v1 = vshrl.u32 %v223_v0, 7  ;;  %v355_v19 = vrot.slane %v1185_v14, 7  ;;  %v1195_v23 = vld [vmem:[%s1151_s29 + $0x18] sm:$0xff]  ;;  %v350_v26 = vrot.slane %v1192_v22, 7  ;;  %v375_v27 = vrot.slane %v1192_v22, 1  ;;  %v1222_v35 = vld [vmem:[%s1151_s29 + $0x20] sm:$0xff] }
  0x55   : > { %v376_v30 = vrot.slane %v1195_v23, 1  ;;  %v1229_v40 = vld [vmem:[%s1151_s29 + $0x28] sm:$0xff]  ;;  %v351_v44 = vrot.slane %v1195_v23, 7  ;;  %v377_v46 = vrot.slane %v1222_v35, 1  ;;  %v352_v48 = vrot.slane %v1222_v35, 7  ;;  %v1246_v49 = vld [vmem:[%s1151_s29 + $0x30] sm:$0xff] }
  0x56   : > { %v238_v2 = vand.u32 15, %v1158_v1  ;;  %vm356_vm0 = vcmp.lt.s32.totalorder %v1158_v1, 1  ;;  %vm381_vm1 = vcmp.lt.s32.totalorder %v1158_v1, 7  ;;  %v226_v3 = vadd.s32 16, %v1158_v1  ;;  %s960_s6 = smov 127   ;;  %s754_s14 = sshll.u32 %s1140_s30, 4 }
  0x57   : > { %v225_v4 = vadd.s32 8, %v1158_v1  ;;  %v227_v5 = vadd.s32 24, %v1158_v1  ;;  %v228_v6 = vadd.s32 32, %v1158_v1  ;;  %v229_v7 = vadd.s32 40, %v1158_v1  ;;  %s201_s17 = scalar_lea.vmem [#allocation7], %s754_s14  ;;  %s762_s28 = sshll.u32 %s1001_s13, 8 }
  0x58   : > { %vm1168_vm2 = vcmp.eq.s32.totalorder %v238_v2, 0  ;;  %v252_v9 = vand.u32 15, %v226_v3  ;;  %v1173_v10 = vadd.s32 48, %v1158_v1  ;;  %v1176_v11 = vadd.s32 56, %v1158_v1  ;;  %s646_s24 = sshll.u32 %s201_s17, 4  ;;  %s1495_s25 = scalar_lea.hbm %s1547_s2, %s762_s28  ;;  %s1497_s24 = int_to_ptr.vmem [resolvable:$true] %s646_s24 }
  0x59   : > { %v245_v15 = vand.u32 15, %v225_v4  ;;  %v259_v16 = vand.u32 15, %v227_v5  ;;  %v266_v17 = vand.u32 15, %v228_v6  ;;  %v364_v28 = vsel %vm356_vm0, %v355_v19, %v348_v18  ;;  %s633_s13 = scalar_lea.sflag [#allocation4], %s1140_s30  ;;  %s882_s7 = scalar_lea.vmem %s1497_s24, 256 }
  0x5a   : > { %vm1197_vm3 = vcmp.eq.s32.totalorder %v252_v9, 0  ;;  %v388_v29 = vsel %vm381_vm1, %v373_v20, %v374_v21  ;;  %v365_v31 = vsel %vm1168_vm2, -inf, %v364_v28  ;;  %v362_v32 = vsel %vm356_vm0, %v349_v25, %v350_v26  ;;  %p883_p13 = scmp.ne.s32.totalorder %s1497_s24, %s882_s7  ;;  %p1575_p1 = scmp.ne.s32.totalorder %s1552_s21, 0 }
  0x5b   : > { %vm339_vm4 = vcmp.eq.s32.totalorder %v245_v15, 15  ;;  %v363_v33 = vsel %vm356_vm0, %v348_v18, %v349_v25  ;;  %v387_v34 = vsel %vm381_vm1, %v374_v21, %v375_v27  ;;  %v398_v36 = vmax.f32 %v365_v31, %v388_v29  ;;  %s962_s8 = smov [#allocation7]  }
  0x5c   : > { %v367_v37 = vsel %vm1197_vm3, -inf, %v362_v32  ;;  %v386_v38 = vsel %vm381_vm1, %v375_v27, %v376_v30  ;;  %v391_v39 = vsel %vm339_vm4, -inf, %v387_v34  ;;  %vm1231_vm5 = vcmp.eq.s32.totalorder %v259_v16, 15  ;;  %p884_p12 = pnand %p883_p13, %p1575_p1  ;;  %s886_s16 = sshll.u32 %s962_s8, 4  ;;  %s887_s16 = int_to_ptr.vmem [resolvable:$false] %s886_s16 }
  0x5d   : > { %v400_v41 = vmax.f32 %v367_v37, %v386_v38  ;;  %v399_v42 = vmax.f32 %v363_v33, %v391_v39  ;;  %v1237_v45 = vmax.f32 %v1179_v12, %v398_v36  ;;  %vm1240_vm6 = vcmp.eq.s32.totalorder %v266_v17, 0  ;;  %s888_s4 = scalar_lea.vmem %s887_s16, 512  ;;  %p889_p5 = scmp.lt.s32.totalorder %s1497_s24, %s887_s16 }
  0x5e   : > { %v361_v52 = vsel %vm356_vm0, %v350_v26, %v351_v44  ;;  %v378_v53 = vrot.slane %v1229_v40, 1  ;;  %v385_v54 = vsel %vm381_vm1, %v376_v30, %v377_v46  ;;  %v360_v55 = vsel %vm356_vm0, %v351_v44, %v352_v48  ;;  %p885_p10 = pneg %p884_p12  ;;  %p890_p7 = scmp.lt.s32.totalorder %s888_s4, %s882_s7 }
  0x5f   : > { %v1249_v50 = vmax.f32 %v1192_v22, %v400_v41  ;;  %v1252_v51 = vmax.f32 %v1182_v13, %v399_v42  ;;  %415 = vrot.lane.b32.xlu0 %v1237_v45, %s958_s20  ;;  %v273_v56 = vand.u32 15, %v229_v7  ;;  %v353_v57 = vrot.slane %v1229_v40, 7 }
  0x60   : > { %v393_v58 = vsel %vm1231_vm5, -inf, %v385_v54  ;;  %v369_v59 = vsel %vm1240_vm6, -inf, %v360_v55  ;;  %v384_v60 = vsel %vm381_vm1, %v377_v46, %v378_v53  ;;  %v379_v61 = vrot.slane %v1246_v49, 1  ;;  %p891_p9 = por %p890_p7, %p889_p5 }
  0x61   : > { %421 = vrot.lane.b32.xlu1 %v1249_v50, %s958_s20  ;;  %v401_v62 = vmax.f32 %v361_v52, %v393_v58  ;;  %v402_v63 = vmax.f32 %v369_v59, %v384_v60  ;;  %vm343_vm7 = vcmp.eq.s32.totalorder %v273_v56, 15  ;;  %v359_v2 = vsel %vm356_vm0, %v352_v48, %v353_v57 }
  0x62   : > { %v383_v3 = vsel %vm381_vm1, %v378_v53, %v379_v61  ;;  %v280_v4 = vand.u32 15, %v1173_v10  ;;  %v354_v5 = vrot.slane %v1246_v49, 7  ;;  %v380_v6 = vrot.slane %v1185_v14, 1  ;;  %p892_p11 = pnand %p891_p9, %p885_p10 }
  0x63   : > { %418 = vrot.lane.b32.xlu0 %v1252_v51, %s958_s20  ;;  %v1283_v7 = vmax.f32 %v1195_v23, %v401_v62  ;;  %v1286_v8 = vmax.f32 %v1222_v35, %v402_v63  ;;  %v395_v9 = vsel %vm343_vm7, -inf, %v383_v3  ;;  %v287_v15 = vand.u32 15, %v1176_v11 }
  0x64   : > { %v403_v16 = vmax.f32 %v359_v2, %v395_v9  ;;  %vm336_vm8 = vcmp.eq.s32.totalorder %v280_v4, 0  ;;  %v358_v10 = vsel %vm356_vm0, %v353_v57, %v354_v5  ;;  %v382_v17 = vsel %vm381_vm1, %v379_v61, %v380_v6 }
  0x65   : > { %424 = vrot.lane.b32.xlu1 %v1283_v7, %s958_s20  ;;  %v371_v18 = vsel %vm336_vm8, -inf, %v358_v10  ;;  %vm345_vm9 = vcmp.eq.s32.totalorder %v287_v15, 15  ;;  %v357_v21 = vsel %vm356_vm0, %v354_v5, %v355_v19  ;;  %v389_v11 = vsel %vm381_vm1, %v380_v6, %v373_v20 }
  0x66   : > { %v1304_v24 = vmax.f32 %v1229_v40, %v403_v16  ;;  %v404_v25 = vmax.f32 %v371_v18, %v382_v17  ;;  %v397_v26 = vsel %vm345_vm9, -inf, %v389_v11  ;;  %v1361_v15 = vand.u32 127, %v223_v0 }
  0x67   : > { %427 = vrot.lane.b32.xlu0 %v1286_v8, %s958_s20  ;;  %v405_v27 = vmax.f32 %v357_v21, %v397_v26  ;;  %v215_v26 = vld [vmem:[%s1144_s3] sm:$0xff]  ;;  %vm559_vm13 = vcmp.ge.f32.partialorder %v1179_v12, 0.7  ;;  %vm560_vm1 = vcmp.ge.f32.partialorder %v1182_v13, 0.7 }
  0x68   : > { %v1309_v28 = vmax.f32 %v1246_v49, %v404_v25  ;;  %vm346_vm11 = vcmp.eq.s32.totalorder %v1361_v15, 0  ;;  %vm347_vm12 = vcmp.eq.s32.totalorder %v1361_v15, 15  ;;  %vm575_vm15 = vcmp.ge.f32.partialorder %v215_v26, 0.7 }
  0x69   : > { %430 = vrot.lane.b32.xlu1 %v1304_v24, %s958_s20  ;;  %v1314_v19 = vmax.f32 %v1185_v14, %v405_v27  ;;  %vm561_vm6 = vcmp.ge.f32.partialorder %v1192_v22, 0.7 }
  0x6b   : > { %433 = vrot.lane.b32.xlu0 %v1309_v28, %s958_s20 }
  0x6d   : > { %436 = vrot.lane.b32.xlu1 %v1314_v19, %s958_s20 }
  0xd1   : > { %v416_v1 = vpop.permute.xlu0 %415 }
  0xd2   : > { %v417_v20 = vsel %vm414_vm10, %v416_v1, %v1237_v45 }
  0xd3   : > { %v422_v29 = vpop.permute.xlu1 %421  ;;  %439 = vrot.lane.b32.xlu0 %v417_v20, %s958_s20 }
  0xd4   : > { %v423_v30 = vsel %vm414_vm10, %v422_v29, %v1249_v50 }
  0xd5   : > { %v419_v31 = vpop.permute.xlu0 %418 }
  0xd6   : > { %v420_v32 = vsel %vm414_vm10, %v419_v31, %v1252_v51 }
  0xd7   : > { %443 = vrot.lane.b32.xlu0 %v423_v30, %s958_s20  ;;  %441 = vrot.lane.b32.xlu1 %v420_v32, %s958_s20  ;;  %v425_v33 = vpop.permute.xlu1 %424  ;;  %v216_v30 = vld [vmem:[%s1144_s3 + $0x8] sm:$0xff] }
  0xd8   : > { %v426_v34 = vsel %vm414_vm10, %v425_v33, %v1283_v7  ;;  %vm576_vm2 = vcmp.ge.f32.partialorder %v216_v30, 0.7 }
  0xd9   : > { %v428_v36 = vpop.permute.xlu0 %427 }
  0xda   : > { %v429_v37 = vsel %vm414_vm10, %v428_v36, %v1286_v8 }
  0xdb   : > { %445 = vrot.lane.b32.xlu1 %v426_v34, %s958_s20  ;;  %447 = vrot.lane.b32.xlu0 %v429_v37, %s958_s20  ;;  %v431_v38 = vpop.permute.xlu1 %430 }
  0xdc   : > { %v432_v39 = vsel %vm414_vm10, %v431_v38, %v1304_v24 }
  0xdd   : > { %v434_v41 = vpop.permute.xlu0 %433 }
  0xde   : > { %v435_v42 = vsel %vm414_vm10, %v434_v41, %v1309_v28  ;;  %v217_v41 = vld [vmem:[%s1144_s3 + $0x10] sm:$0xff] }
  0xdf   : > { %449 = vrot.lane.b32.xlu1 %v432_v39, %s958_s20  ;;  %451 = vrot.lane.b32.xlu0 %v435_v42, %s958_s20  ;;  %v437_v43 = vpop.permute.xlu1 %436  ;;  %vm577_vm9 = vcmp.ge.f32.partialorder %v217_v41, 0.7 }
  0xe0   : > { %v438_v44 = vsel %vm414_vm10, %v437_v43, %v1314_v19 }
  0xe3   : > { %453 = vrot.lane.b32.xlu1 %v438_v44, %s958_s20 }
 0x145   : > { %v440_v46 = vpop.permute.xlu0 %439 }
 0x146   : > { %v455_v47 = vsel %vm414_vm10, %v440_v46, %v1237_v45  ;;  %v218_v46 = vld [vmem:[%s1144_s3 + $0x18] sm:$0xff] }
 0x147   : > { %471 = vrot.lane.b32.xlu0 %v455_v47, %s959_s5 }
 0x149   : > { %v442_v48 = vpop.permute.xlu1 %441  ;;  %v444_v52 = vpop.permute.xlu0 %443 }
 0x14a   : > { %v456_v53 = vsel %vm414_vm10, %v442_v48, %v1252_v51  ;;  %v457_v54 = vsel %vm414_vm10, %v444_v52, %v1249_v50 }
 0x14b   : > { %473 = vrot.lane.b32.xlu1 %v456_v53, %s959_s5  ;;  %475 = vrot.lane.b32.xlu0 %v457_v54, %s959_s5 }
 0x14d   : > { %v446_v55 = vpop.permute.xlu1 %445  ;;  %v448_v56 = vpop.permute.xlu0 %447 }
 0x14e   : > { %v458_v57 = vsel %vm414_vm10, %v446_v55, %v1283_v7  ;;  %v459_v58 = vsel %vm414_vm10, %v448_v56, %v1286_v8 }
 0x14f   : > { %477 = vrot.lane.b32.xlu1 %v458_v57, %s959_s5  ;;  %479 = vrot.lane.b32.xlu0 %v459_v58, %s959_s5 }
 0x151   : > { %v450_v59 = vpop.permute.xlu1 %449  ;;  %v452_v60 = vpop.permute.xlu0 %451 }
 0x152   : > { %v460_v61 = vsel %vm414_vm10, %v450_v59, %v1304_v24  ;;  %v461_v62 = vsel %vm414_vm10, %v452_v60, %v1309_v28 }
 0x153   : > { %481 = vrot.lane.b32.xlu1 %v460_v61, %s959_s5  ;;  %483 = vrot.lane.b32.xlu0 %v461_v62, %s959_s5 }
 0x155   : > { %v454_v63 = vpop.permute.xlu1 %453 }
 0x156   : > { %v462_v2 = vsel %vm414_vm10, %v454_v63, %v1314_v19  ;;  %vm562_vm10 = vcmp.ge.f32.partialorder %v1195_v23, 0.7 }
 0x157   : > { %485 = vrot.lane.b32.xlu1 %v462_v2, %s959_s5  ;;  %503 = vrot.lane.b32.xlu0 %v455_v47, %s960_s6 }
 0x15b   : > { %505 = vrot.lane.b32.xlu1 %v456_v53, %s960_s6  ;;  %507 = vrot.lane.b32.xlu0 %v457_v54, %s960_s6 }
 0x15f   : > { %509 = vrot.lane.b32.xlu1 %v458_v57, %s960_s6  ;;  %511 = vrot.lane.b32.xlu0 %v459_v58, %s960_s6 }
 0x163   : > { %513 = vrot.lane.b32.xlu1 %v460_v61, %s960_s6  ;;  %515 = vrot.lane.b32.xlu0 %v461_v62, %s960_s6  ;;  %v220_v62 = vld [vmem:[%s1144_s3 + $0x28] sm:$0xff] }
 0x167   : > { %517 = vrot.lane.b32.xlu1 %v462_v2, %s960_s6  ;;  %v961_v2 = vmov 0  }
 0x1b9   : > { %v472_v3 = vpop.permute.xlu0 %471 }
 0x1ba   : > { %v495_v21 = vsel %vm346_vm11, -inf, %v472_v3 }
 0x1bd   : > { %v474_v4 = vpop.permute.xlu1 %473  ;;  %v476_v5 = vpop.permute.xlu0 %475 }
 0x1be   : > { %v496_v20 = vsel %vm346_vm11, -inf, %v474_v4  ;;  %v497_v29 = vsel %vm346_vm11, -inf, %v476_v5 }
 0x1c1   : > { %v478_v6 = vpop.permute.xlu1 %477  ;;  %v480_v9 = vpop.permute.xlu0 %479 }
 0x1c2   : > { %v498_v39 = vsel %vm346_vm11, -inf, %v478_v6 }
 0x1c5   : > { %v482_v16 = vpop.permute.xlu1 %481  ;;  %v484_v10 = vpop.permute.xlu0 %483 }
 0x1c6   : > { %v500_v47 = vsel %vm346_vm11, -inf, %v482_v16  ;;  %v501_v54 = vsel %vm346_vm11, -inf, %v484_v10  ;;  %v222_v16 = vld [vmem:[%s1144_s3 + $0x38] sm:$0xff] }
 0x1c9   : > { %v486_v17 = vpop.permute.xlu1 %485  ;;  %v504_v18 = vpop.permute.xlu0 %503 }
 0x1ca   : > { %v527_v11 = vsel %vm347_vm12, -inf, %v504_v18 }
 0x1cb   : > { %v535_v25 = vmax.f32 %v495_v21, %v527_v11 }
 0x1cd   : > { %v543_v0 = vmax.f32 %v1237_v45, %v535_v25  ;;  %v506_v27 = vpop.permute.xlu1 %505  ;;  %v508_v1 = vpop.permute.xlu0 %507 }
 0x1ce   : > { %v528_v31 = vsel %vm347_vm12, -inf, %v506_v27  ;;  %v529_v32 = vsel %vm347_vm12, -inf, %v508_v1 }
 0x1cf   : > { %vm551_vm14 = vcmp.eq.f32.partialorder %v1179_v12, %v543_v0  ;;  %v536_v33 = vmax.f32 %v496_v20, %v528_v31  ;;  %v537_v45 = vmax.f32 %v497_v29, %v529_v32  ;;  %v499_v12 = vsel %vm346_vm11, -inf, %v480_v9 }
 0x1d0   : > { %vm567_vm0 = vmand %vm551_vm14, %vm559_vm13 }
 0x1d1   : > { %v544_v34 = vmax.f32 %v1252_v51, %v536_v33  ;;  %v545_v36 = vmax.f32 %v1249_v50, %v537_v45  ;;  %v510_v37 = vpop.permute.xlu1 %509  ;;  %v512_v38 = vpop.permute.xlu0 %511  ;;  %vm1394_vm3 = vmand %vm567_vm0, %vm575_vm15  ;;  %vm578_vm15 = vcmp.ge.f32.partialorder %v218_v46, 0.7 }
 0x1d2   : > { %v530_v42 = vsel %vm347_vm12, -inf, %v510_v37  ;;  %v531_v43 = vsel %vm347_vm12, -inf, %v512_v38 }
 0x1d3   : > { %vm552_vm4 = vcmp.eq.f32.partialorder %v1182_v13, %v544_v34  ;;  %v538_v50 = vmax.f32 %v498_v39, %v530_v42  ;;  %v539_v44 = vmax.f32 %v499_v12, %v531_v43  ;;  %vm553_vm7 = vcmp.eq.f32.partialorder %v1192_v22, %v545_v36 }
 0x1d4   : > { %vm568_vm5 = vmand %vm552_vm4, %vm560_vm1  ;;  %v502_v22 = vsel %vm346_vm11, -inf, %v486_v17 }
 0x1d5   : > { %vm1407_vm8 = vmand %vm568_vm5, %vm576_vm2  ;;  %v546_v13 = vmax.f32 %v1283_v7, %v538_v50  ;;  %v514_v52 = vpop.permute.xlu1 %513  ;;  %v516_v53 = vpop.permute.xlu0 %515  ;;  %v547_v55 = vmax.f32 %v1286_v8, %v539_v44  ;;  %v219_v8 = vld [vmem:[%s1144_s3 + $0x20] sm:$0xff]  ;;  %vm563_vm5 = vcmp.ge.f32.partialorder %v1222_v35, 0.7 }
 0x1d6   : > { %vm591_vm13 = vmpackc.low %vm1407_vm8, %vm1394_vm3  ;;  %v532_v56 = vsel %vm347_vm12, -inf, %v514_v52  ;;  %v533_v57 = vsel %vm347_vm12, -inf, %v516_v53 }
 0x1d7   : > { %vm569_vm14 = vmand %vm553_vm7, %vm561_vm6  ;;  %vm554_vm0 = vcmp.eq.f32.partialorder %v1195_v23, %v546_v13  ;;  %v540_v7 = vmax.f32 %v500_v47, %v532_v56  ;;  %v541_v58 = vmax.f32 %v501_v54, %v533_v57  ;;  %vm555_vm6 = vcmp.eq.f32.partialorder %v1222_v35, %v547_v55  ;;  %v221_v35 = vld [vmem:[%s1144_s3 + $0x30] sm:$0xff] }
 0x1d8   : > { %vm1428_vm1 = vmand %vm569_vm14, %vm577_vm9  ;;  %vm579_vm9 = vcmp.ge.f32.partialorder %v219_v8, 0.7 }
 0x1d9   : > { %vm570_vm2 = vmand %vm554_vm0, %vm562_vm10  ;;  %v548_v60 = vmax.f32 %v1304_v24, %v540_v7  ;;  %v518_v61 = vpop.permute.xlu1 %517  ;;  %v549_v23 = vmax.f32 %v1309_v28, %v541_v58  ;;  %vm564_vm10 = vcmp.ge.f32.partialorder %v1229_v40, 0.7  ;;  %vm581_vm0 = vcmp.ge.f32.partialorder %v221_v35, 0.7 }
 0x1da   : > { %vm586_vm4 = vmand %vm570_vm2, %vm578_vm15  ;;  %v534_v63 = vsel %vm347_vm12, -inf, %v518_v61  ;;  %vm580_vm15 = vcmp.ge.f32.partialorder %v220_v62, 0.7 }
 0x1db   : > { %vm592_vm7 = vmpackc.low %vm586_vm4, %vm1428_vm1  ;;  %v542_v24 = vmax.f32 %v502_v22, %v534_v63  ;;  %vm556_vm14 = vcmp.eq.f32.partialorder %v1229_v40, %v548_v60  ;;  %vm557_vm1 = vcmp.eq.f32.partialorder %v1246_v49, %v549_v23  ;;  %vm623_vm4 = vcmask 123904  }
 0x1dc   : > { %vm593_vm11 = vmpackc.even %vm592_vm7, %vm591_vm13  ;;  %vm565_vm13 = vcmp.ge.f32.partialorder %v1246_v49, 0.7  ;;  %vm582_vm7 = vcmp.ge.f32.partialorder %v222_v16, 0.7 }
 0x1dd   : > { %v597_v3 = vsel %vm593_vm11, 16843009, %v961_v2  ;;  %vm571_vm12 = vmand %vm555_vm6, %vm563_vm5  ;;  %v550_v4 = vmax.f32 %v1314_v19, %v542_v24  ;;  %vm566_vm6 = vcmp.ge.f32.partialorder %v1185_v14, 0.7 }
 0x1de   : > { %v599_v28 = vunpack.c.0.s8 %v597_v3  ;;  %v600_v5 = vunpack.c.1.s8 %v597_v3  ;;  %v601_v6 = vunpack.c.2.s8 %v597_v3  ;;  %v602_v9 = vunpack.c.3.s8 %v597_v3  ;;  %vm1457_vm3 = vmand %vm571_vm12, %vm579_vm9 }
 0x1df   : > { %vm572_vm8 = vmand %vm556_vm14, %vm564_vm10  ;;  %vm558_vm9 = vcmp.eq.f32.partialorder %v1185_v14, %v550_v4 }
 0x1e0   : > { %v607_v19 = vpack.c.b16 %v599_v28, %v599_v28  ;;  %v609_v10 = vpack.c.b16 %v600_v5, %v600_v5  ;;  %v611_v17 = vpack.c.b16 %v601_v6, %v601_v6  ;;  %v613_v18 = vpack.c.b16 %v602_v9, %v602_v9  ;;  %vm1467_vm2 = vmand %vm572_vm8, %vm580_vm15 }
 0x1e1   : > { %vm594_vm5 = vmpackc.low %vm1467_vm2, %vm1457_vm3 }
 0x1e2   : > { %v608_v40 = vpack.c.b8 %v607_v19, %v607_v19  ;;  %v610_v11 = vpack.c.b8 %v609_v10, %v609_v10  ;;  %v612_v25 = vpack.c.b8 %v611_v17, %v611_v17  ;;  %v614_v26 = vpack.c.b8 %v613_v18, %v613_v18  ;;  %vm573_vm11 = vmand %vm557_vm1, %vm565_vm13 }
 0x1e3   : > { %vm589_vm10 = vmand %vm573_vm11, %vm581_vm0 }
 0x1e4   : > { %624 = vst.msk [vmem:[%s201_s17] sm:$0x3] %vm623_vm4, %v608_v40  ;;  %625 = vst.msk [vmem:[%s201_s17 + $0x2] sm:$0x3] %vm623_vm4, %v610_v11 }
 0x1e5   : > { %626 = vst.msk [vmem:[%s201_s17 + $0x4] sm:$0x3] %vm623_vm4, %v612_v25  ;;  %627 = vst.msk [vmem:[%s201_s17 + $0x6] sm:$0x3] %vm623_vm4, %v614_v26 }
 0x1e6   : > { %vm574_vm14 = vmand %vm558_vm9, %vm566_vm6 }
 0x1e7   : > { %vm590_vm12 = vmand %vm574_vm14, %vm582_vm7 }
 0x1e8   : > { %vm595_vm15 = vmpackc.low %vm590_vm12, %vm589_vm10 }
 0x1e9   : > { %vm596_vm8 = vmpackc.even %vm595_vm15, %vm594_vm5 }
 0x1ea   : > { %v598_v14 = vsel %vm596_vm8, 16843009, %v961_v2 }
 0x1eb   : > { %v603_v49 = vunpack.c.0.s8 %v598_v14  ;;  %v604_v0 = vunpack.c.1.s8 %v598_v14  ;;  %v605_v27 = vunpack.c.2.s8 %v598_v14  ;;  %v606_v1 = vunpack.c.3.s8 %v598_v14 }
 0x1ed   : > { %v615_v20 = vpack.c.b16 %v603_v49, %v603_v49  ;;  %v617_v29 = vpack.c.b16 %v604_v0, %v604_v0  ;;  %v619_v30 = vpack.c.b16 %v605_v27, %v605_v27  ;;  %v621_v31 = vpack.c.b16 %v606_v1, %v606_v1 }
 0x1ef   : > { %v616_v32 = vpack.c.b8 %v615_v20, %v615_v20  ;;  %v618_v33 = vpack.c.b8 %v617_v29, %v617_v29  ;;  %v620_v45 = vpack.c.b8 %v619_v30, %v619_v30  ;;  %v622_v34 = vpack.c.b8 %v621_v31, %v621_v31 }
 0x1f1   : > { %628 = vst.msk [vmem:[%s201_s17 + $0x8] sm:$0x3] %vm623_vm4, %v616_v32  ;;  %629 = vst.msk [vmem:[%s201_s17 + $0xa] sm:$0x3] %vm623_vm4, %v618_v33 }
 0x1f2   : > { %630 = vst.msk [vmem:[%s201_s17 + $0xc] sm:$0x3] %vm623_vm4, %v620_v45  ;;  %631 = vst.msk [vmem:[%s201_s17 + $0xe] sm:$0x3] %vm623_vm4, %v622_v34 }
 0x1f3   : > { %895 = shalt.err (!%p892_p11)
}
 0x1f4   : > { %s896_s19 = scalar_lea.hbm %s1495_s25, 256  ;;  %s900_s29 = scalar_lea.hbm %s1547_s2, 512 }
 0x1f5   : > { %p897_p3 = scmp.ne.s32.totalorder %s1495_s25, %s896_s19  ;;  %p901_p2 = scmp.lt.u32.totalorder %s1495_s25, %s1547_s2 }
 0x1f6   : > { %p902_p4 = scmp.lt.u32.totalorder %s900_s29, %s896_s19  ;;  %p904_p13 = scmp.lt.u32.totalorder %s896_s19, %s1495_s25 }
 0x1f7   : > { %p898_p8 = pnand %p897_p3, %p1575_p1 }
 0x1f8   : > { %p903_p6 = por %p902_p4, %p901_p2 }
 0x1f9   : > { %p899_p0 = pneg %p898_p8 }
 0x1fa   : > { %p905_p12 = por %p904_p13, %p903_p6 }
 0x1fc   : > { %p906_p10 = pnand %p905_p12, %p899_p0 }
 0x1fe   : > { %909 = shalt.err (!%p906_p10)
}
 0x1ff   : > { %s963_s6 = smov 32   ;;  %s964_s14 = smov 2  }
 0x200   : > { %767 = dma.vmem_to_hbm [thread:$0]  (%p1575_p1), %s1497_s24, 256, %s1495_s25, %s633_s13, %s963_s6, %s963_s6, %s964_s14  }
 0x201 PF: > { %s661_s17 = sand.u32 1, %s940_s9   ;;  %p1576_p5 = scmp.ne.s32.totalorder %s1553_s22, 0 }
 0x202   : > { %p1577_p7 = scmp.ge.s32.totalorder %s952_s12, 2  ;;  %s662_s28 = scalar_lea.sflag [#allocation4], %s661_s17 }
 0x204   : > { %p777_p9 = pnand %p1577_p7, %p1576_p5 }
 0x206   : > { %935 = dma.done.wait (!%p777_p9), %s662_s28, 256  }
 0x207   : > { %937 = vsyncadd (!%p777_p9), %s662_s28, 4294967040  ;;  %p18_p11 = scmp.ge.s32.totalorder %s1005_s15, 4   ;;  %s1578_s9 = smov %s944_s10 }
 0x208   : > { %s1579_s10 = smov %s948_s11  ;;  %s1580_s11 = smov %s1017_s18 }
 0x209   : > { %s1581_s12 = smov %s1005_s15  ;;  %20 = sbr.rel (!%p18_p11) target bundleno = 7 (0x7), region = 86 }
 0x210   :  { %667 = vsyncpa [#allocation3], 1 }
 0x211   :  { %669 = vsyncpa [#allocation3 + $0x1], 1 }
 0x212   :  { %670 = vsyncpa [#allocation6], 1 }
 0x213   :  { %672 = vsyncpa [#allocation6 + $0x1], 1 }
 0x214   :  { %673 = vsyncpa [#allocation4], 1 }
 0x215   :  { %675 = vsyncpa [#allocation4 + $0x1], 1 }

</bundles_post_ra>
